<compile_context>
chip_gen: v7x
topology: tpu7x:2x2x1
jax: 0.10.0
libtpu: 0.0.40
codegen_flags: <defaults>
</compile_context>

<pallas_src>
import functools

import jax
import jax.numpy as jnp
from jax import lax
from jax.experimental import pallas as pl
from jax.experimental.pallas import tpu as pltpu

HIDDEN = 64
BN_EPS = 1e-5
MAX_BATCH_TILE = 4096                 # rows per batch tile (multiple of 8)
VMEM_LIMIT = 48 * 1024 * 1024         # <= ~48 MiB keeps v7x (64 MiB physical) happy


def _round_up(n, m):
    return ((n + m - 1) // m) * m


def _choose_tile(batch, max_tile):
    """Multiple-of-8 batch tile; balances tiles to minimize row padding."""
    b8 = _round_up(batch, 8)
    if b8 <= max_tile:
        return b8
    ntiles = pl.cdiv(b8, max_tile)
    return _round_up(pl.cdiv(b8, ntiles), 8)


def _fc(x_f32, w_bf16, b_f32):
    """Linear layer: bf16 MXU operands, f32 accumulation, f32 bias."""
    return jnp.dot(x_f32.astype(jnp.bfloat16), w_bf16,
                   preferred_element_type=jnp.float32) + b_f32


# ----------------------------------------------------------------------------
# Fused kernel: whole (padded) batch fits one tile.  Reads x once; BN stats
# computed in-register (padded rows masked out of the statistics).
# ----------------------------------------------------------------------------
def _fused_bn_kernel(x_ref, w1_ref, b1_ref, g1_ref, be1_ref,
                     w2_ref, b2_ref, g2_ref, be2_ref,
                     w3_ref, b3_ref, o_ref, *, batch):
    rows = x_ref.shape[0]
    valid = lax.broadcasted_iota(jnp.int32, (rows, 1), 0) < batch
    inv_b = 1.0 / batch

    def bn(h, g, be):
        hm = jnp.where(valid, h, 0.0)
        mean = jnp.sum(hm, axis=0, keepdims=True) * inv_b
        var = jnp.sum(hm * hm, axis=0, keepdims=True) * inv_b - mean * mean
        return (h - mean) * (lax.rsqrt(var + BN_EPS) * g) + be

    h1 = jnp.maximum(_fc(x_ref[...], w1_ref[...], b1_ref[...]), 0.0)
    h1 = bn(h1, g1_ref[...], be1_ref[...])
    h2 = jnp.maximum(_fc(h1, w2_ref[...], b2_ref[...]), 0.0)
    h2 = bn(h2, g2_ref[...], be2_ref[...])
    o_ref[...] = _fc(h2, w3_ref[...], b3_ref[...]).astype(o_ref.dtype)


# ----------------------------------------------------------------------------
# Multi-tile BN path, call 1/2: statistics kernel.
#   grid = (2, nb): phase 0 accumulates sum/sum-sq of h1 = relu(fc1(x));
#   phase 1 accumulates stats of h2 = relu(fc2(bn1(h1))).
#   The four (1, HIDDEN) outputs use a constant block index -> VMEM-resident
#   accumulators, written back to HBM exactly once at the end of the grid.
# ----------------------------------------------------------------------------
def _bn_stats_kernel(x_ref, w1_ref, b1_ref, g1_ref, be1_ref,
                     w2_ref, b2_ref,
                     s1_sum, s1_sq, s2_sum, s2_sq, *, batch, tile):
    phase = pl.program_id(0)
    t = pl.program_id(1)

    @pl.when((phase == 0) & (t == 0))
    def _():
        s1_sum[...] = jnp.zeros_like(s1_sum)
        s1_sq[...] = jnp.zeros_like(s1_sq)
        s2_sum[...] = jnp.zeros_like(s2_sum)
        s2_sq[...] = jnp.zeros_like(s2_sq)

    # Mask rows past the real batch (zero-padded x still yields relu(b1) != 0).
    row0 = t * tile
    valid = (row0 + lax.broadcasted_iota(jnp.int32, (tile, 1), 0)) < batch

    def accumulate(sum_ref, sq_ref, h):
        hm = jnp.where(valid, h, 0.0)
        sum_ref[...] += jnp.sum(hm, axis=0, keepdims=True)
        sq_ref[...] += jnp.sum(hm * hm, axis=0, keepdims=True)

    h1 = jnp.maximum(_fc(x_ref[...], w1_ref[...], b1_ref[...]), 0.0)

    @pl.when(phase == 0)
    def _():
        accumulate(s1_sum, s1_sq, h1)

    @pl.when(phase == 1)
    def _():
        inv_b = 1.0 / batch
        m1 = s1_sum[...] * inv_b
        v1 = s1_sq[...] * inv_b - m1 * m1
        h1n = (h1 - m1) * (lax.rsqrt(v1 + BN_EPS) * g1_ref[...]) + be1_ref[...]
        h2 = jnp.maximum(_fc(h1n, w2_ref[...], b2_ref[...]), 0.0)
        accumulate(s2_sum, s2_sq, h2)


# ----------------------------------------------------------------------------
# Multi-tile BN path, call 2/2: apply kernel (batch-parallel).
#   bn1 -> fc2 -> bn2 -> fc3 -> store, one batch tile per grid step.
# ----------------------------------------------------------------------------
def _bn_apply_kernel(x_ref, w1_ref, b1_ref, g1_ref, be1_ref,
                     w2_ref, b2_ref, g2_ref, be2_ref,
                     w3_ref, b3_ref,
                     s1_sum, s1_sq, s2_sum, s2_sq, o_ref, *, batch):
    inv_b = 1.0 / batch

    def bn(h, sum_ref, sq_ref, g_ref, be_ref):
        m = sum_ref[...] * inv_b
        v = sq_ref[...] * inv_b - m * m
        return (h - m) * (lax.rsqrt(v + BN_EPS) * g_ref[...]) + be_ref[...]

    h1 = jnp.maximum(_fc(x_ref[...], w1_ref[...], b1_ref[...]), 0.0)
    h1 = bn(h1, s1_sum, s1_sq, g1_ref, be1_ref)
    h2 = jnp.maximum(_fc(h1, w2_ref[...], b2_ref[...]), 0.0)
    h2 = bn(h2, s2_sum, s2_sq, g2_ref, be2_ref)
    o_ref[...] = _fc(h2, w3_ref[...], b3_ref[...]).astype(o_ref.dtype)


# ----------------------------------------------------------------------------
# Wrapper
# ----------------------------------------------------------------------------
def actor_forward(x, params, max_batch_tile=MAX_BATCH_TILE):
    """x: (B, obs_dim+goal_dim) float32. params: dict from init_params."""
    batch, in_dim = x.shape
    act_dim = params["w3"].shape[1]

    w1 = params["w1"].astype(jnp.bfloat16)
    w2 = params["w2"].astype(jnp.bfloat16)
    w3 = params["w3"].astype(jnp.bfloat16)
    b1, b2, b3 = params["b1"], params["b2"], params["b3"]
    g1, be1 = params["g1"], params["be1"]
    g2, be2 = params["g2"], params["be2"]

    if batch == 1:
        # PyTorch skips both BatchNorms for a batch of one.  A 1-row MLP is
        # pure launch/DMA overhead for a custom kernel; plain XLA is as fast.
        h = jnp.maximum(_fc(x, w1, b1), 0.0)
        h = jnp.maximum(_fc(h, w2, b2), 0.0)
        return _fc(h, w3, b3)

    # Batch tiling: multiple-of-8 tiles; pad rows if needed, mask them in-kernel.
    tile = _choose_tile(batch, max_batch_tile)
    nb = pl.cdiv(batch, tile)
    padded = tile * nb
    if padded != batch:
        x = jnp.pad(x, ((0, padded - batch), (0, 0)))

    if nb == 1:
        # Whole batch in one tile: single fused kernel, x read exactly once.
        out = pl.pallas_call(
            functools.partial(_fused_bn_kernel, batch=batch),
            out_shape=jax.ShapeDtypeStruct((padded, act_dim), jnp.float32),
            compiler_params=pltpu.CompilerParams(vmem_limit_bytes=VMEM_LIMIT),
        )(x, w1, b1, g1, be1, w2, b2, g2, be2, w3, b3)
        return out[:batch]

    const2 = lambda p, t: (0, 0)
    const1 = lambda t: (0, 0)

    # Pass 1: batch statistics (tiny (1, 64) outputs, resident accumulators).
    s1_sum, s1_sq, s2_sum, s2_sq = pl.pallas_call(
        functools.partial(_bn_stats_kernel, batch=batch, tile=tile),
        out_shape=[jax.ShapeDtypeStruct((1, HIDDEN), jnp.float32)] * 4,
        grid_spec=pltpu.PrefetchScalarGridSpec(
            num_scalar_prefetch=0,
            grid=(2, nb),  # (phase, batch tile); phase outermost
            in_specs=[
                pl.BlockSpec((tile, in_dim), lambda p, t: (t, 0)),
                pl.BlockSpec((in_dim, HIDDEN), const2),
                pl.BlockSpec((1, HIDDEN), const2),
                pl.BlockSpec((1, HIDDEN), const2),
                pl.BlockSpec((1, HIDDEN), const2),
                pl.BlockSpec((HIDDEN, HIDDEN), const2),
                pl.BlockSpec((1, HIDDEN), const2),
            ],
            out_specs=[pl.BlockSpec((1, HIDDEN), const2)] * 4,
        ),
        compiler_params=pltpu.CompilerParams(
            dimension_semantics=("arbitrary", "arbitrary"),
            vmem_limit_bytes=VMEM_LIMIT),
    )(x, w1, b1, g1, be1, w2, b2)

    # Pass 2: normalize + fc3, batch-parallel across tiles (megacore on v7x).
    out = pl.pallas_call(
        functools.partial(_bn_apply_kernel, batch=batch),
        out_shape=jax.ShapeDtypeStruct((padded, act_dim), jnp.float32),
        grid_spec=pltpu.PrefetchScalarGridSpec(
            num_scalar_prefetch=0,
            grid=(nb,),
            in_specs=[
                pl.BlockSpec((tile, in_dim), lambda t: (t, 0)),
                pl.BlockSpec((in_dim, HIDDEN), const1),
                pl.BlockSpec((1, HIDDEN), const1),
                pl.BlockSpec((1, HIDDEN), const1),
                pl.BlockSpec((1, HIDDEN), const1),
                pl.BlockSpec((HIDDEN, HIDDEN), const1),
                pl.BlockSpec((1, HIDDEN), const1),
                pl.BlockSpec((1, HIDDEN), const1),
                pl.BlockSpec((1, HIDDEN), const1),
                pl.BlockSpec((HIDDEN, act_dim), const1),
                pl.BlockSpec((1, act_dim), const1),
                pl.BlockSpec((1, HIDDEN), const1),
                pl.BlockSpec((1, HIDDEN), const1),
                pl.BlockSpec((1, HIDDEN), const1),
                pl.BlockSpec((1, HIDDEN), const1),
            ],
            out_specs=pl.BlockSpec((tile, act_dim), lambda t: (t, 0)),
        ),
        compiler_params=pltpu.CompilerParams(
            dimension_semantics=("parallel",),
            vmem_limit_bytes=VMEM_LIMIT),
    )(x, w1, b1, g1, be1, w2, b2, g2, be2, w3, b3, s1_sum, s1_sq, s2_sum, s2_sq)

    return out[:batch]


# ----------------------------------------------------------------------------
# Params + pure-JAX reference
# ----------------------------------------------------------------------------
def init_params(key, in_dim, act_dim):
    """Deterministic synthetic init (PyTorch-Linear-style uniform ranges)."""
    ks = jax.random.split(key, 6)

    def lin(kw, kb, fan_in, fan_out):
        bound = 1.0 / jnp.sqrt(fan_in)
        w = jax.random.uniform(kw, (fan_in, fan_out), jnp.float32, -bound, bound)
        b = jax.random.uniform(kb, (1, fan_out), jnp.float32, -bound, bound)
        return w, b

    w1, b1 = lin(ks[0], ks[1], in_dim, HIDDEN)
    w2, b2 = lin(ks[2], ks[3], HIDDEN, HIDDEN)
    w3, b3 = lin(ks[4], ks[5], HIDDEN, act_dim)
    return dict(
        w1=w1, b1=b1,
        g1=jnp.ones((1, HIDDEN), jnp.float32), be1=jnp.zeros((1, HIDDEN), jnp.float32),
        w2=w2, b2=b2,
        g2=jnp.ones((1, HIDDEN), jnp.float32), be2=jnp.zeros((1, HIDDEN), jnp.float32),
        w3=w3, b3=b3,
    )


def _reference_forward(x, params):
    """Pure-JAX reference mirroring the kernel math (bf16 MXU operands, f32 accum)."""
    w1 = params["w1"].astype(jnp.bfloat16)
    w2 = params["w2"].astype(jnp.bfloat16)
    w3 = params["w3"].astype(jnp.bfloat16)

    h = _fc(x, w1, params["b1"])
    h = jnp.maximum(h, 0.0)
    if x.shape[0] != 1:
        m = jnp.mean(h, 0, keepdims=True)
        v = jnp.mean(h * h, 0, keepdims=True) - m * m
        h = (h - m) * lax.rsqrt(v + BN_EPS) * params["g1"] + params["be1"]
    h = _fc(h, w2, params["b2"])
    h = jnp.maximum(h, 0.0)
    if x.shape[0] != 1:
        m = jnp.mean(h, 0, keepdims=True)
        v = jnp.mean(h * h, 0, keepdims=True) - m * m
        h = (h - m) * lax.rsqrt(v + BN_EPS) * params["g2"] + params["be2"]
    return _fc(h, w3, params["b3"])


if __name__ == "__main__":
    key = jax.random.PRNGKey(0)
    obs_dim, goal_dim, act_dim = 16, 8, 4
    in_dim = obs_dim + goal_dim

    kx, kp = jax.random.split(key)
    params = init_params(kp, in_dim, act_dim)

    # Fused single-tile BN path.
    x8 = jax.random.normal(kx, (8, in_dim), jnp.float32)
    out8 = jax.block_until_ready(actor_forward(x8, params))
    ref8 = _reference_forward(x8, params)
    assert out8.shape == (8, act_dim)
    assert jnp.allclose(out8, ref8, atol=2e-3, rtol=2e-3)

    # Multi-tile BN path (stats + apply split), 4 tiles of 8 rows.
    x32 = jax.random.normal(jax.random.fold_in(kx, 1), (32, in_dim), jnp.float32)
    out32 = jax.block_until_ready(actor_forward(x32, params, max_batch_tile=8))
    ref32 = _reference_forward(x32, params)
    assert out32.shape == (32, act_dim)
    assert jnp.allclose(out32, ref32, atol=2e-3, rtol=2e-3)

    # Ragged batch: exercises row padding + stats masking on both paths.
    x13 = jax.random.normal(jax.random.fold_in(kx, 2), (13, in_dim), jnp.float32)
    ref13 = _reference_forward(x13, params)
    out13a = jax.block_until_ready(actor_forward(x13, params))                      # fused, masked
    out13b = jax.block_until_ready(actor_forward(x13, params, max_batch_tile=8))    # split, masked
    assert out13a.shape == (13, act_dim) and out13b.shape == (13, act_dim)
    assert jnp.allclose(out13a, ref13, atol=2e-3, rtol=2e-3)
    assert jnp.allclose(out13b, ref13, atol=2e-3, rtol=2e-3)

    # batch == 1 path (PyTorch skips BatchNorm; plain XLA per perf review).
    out1 = jax.block_until_ready(actor_forward(x8[:1], params))
    ref1 = _reference_forward(x8[:1], params)
    assert jnp.allclose(out1, ref1, atol=2e-3, rtol=2e-3)

    print("KERNEL_OK")
</pallas_src>

<mosaic_0001>
module attributes {stable_mosaic.version = 11 : i64} {
  func.func @_fused_bn_kernel(%arg0: memref<8x24xf32, #tpu.memory_space<vmem>>, %arg1: memref<24x64xbf16, #tpu.memory_space<vmem>>, %arg2: memref<1x64xf32, #tpu.memory_space<vmem>>, %arg3: memref<1x64xf32, #tpu.memory_space<vmem>>, %arg4: memref<1x64xf32, #tpu.memory_space<vmem>>, %arg5: memref<64x64xbf16, #tpu.memory_space<vmem>>, %arg6: memref<1x64xf32, #tpu.memory_space<vmem>>, %arg7: memref<1x64xf32, #tpu.memory_space<vmem>>, %arg8: memref<1x64xf32, #tpu.memory_space<vmem>>, %arg9: memref<64x4xbf16, #tpu.memory_space<vmem>>, %arg10: memref<1x4xf32, #tpu.memory_space<vmem>>, %arg11: memref<8x4xf32, #tpu.memory_space<vmem>>) attributes {dimension_semantics = [], scalar_prefetch = 0 : i64, scratch_operands = 0 : i64, tpu.core_type = #tpu.core_type<tc>} {
    %0 = tpu.iota {dimensions = array<i32: 0>} : vector<8x1xi32>
    %c8_i32 = arith.constant 8 : i32
    %1 = vector.broadcast %c8_i32 : i32 to vector<8x1xi32>
    %2 = arith.cmpi slt, %0, %1 : vector<8x1xi32>
    %c0 = arith.constant 0 : index
    %c0_0 = arith.constant 0 : index
    %3 = vector.load %arg0[%c0, %c0_0] : memref<8x24xf32, #tpu.memory_space<vmem>>, vector<8x24xf32>
    %c0_1 = arith.constant 0 : index
    %c0_2 = arith.constant 0 : index
    %4 = vector.load %arg1[%c0_1, %c0_2] : memref<24x64xbf16, #tpu.memory_space<vmem>>, vector<24x64xbf16>
    %c0_3 = arith.constant 0 : index
    %c0_4 = arith.constant 0 : index
    %5 = vector.load %arg2[%c0_3, %c0_4] : memref<1x64xf32, #tpu.memory_space<vmem>>, vector<1x64xf32>
    %6 = arith.truncf %3 : vector<8x24xf32> to vector<8x24xbf16>
    %cst = arith.constant dense<0.000000e+00> : vector<8x64xf32>
    %7 = tpu.matmul %6, %4, %cst {dimension_numbers = #tpu.dot_dimension_numbers<[1], [0], [0], [1], [0, 0, 1, 1], [], []>} : vector<8x24xbf16>, vector<24x64xbf16>, vector<8x64xf32> -> vector<8x64xf32>
    %8 = vector.broadcast %5 : vector<1x64xf32> to vector<8x64xf32>
    %9 = arith.addf %7, %8 : vector<8x64xf32>
    %cst_5 = arith.constant 0.000000e+00 : f32
    %10 = vector.broadcast %cst_5 : f32 to vector<8x64xf32>
    %11 = arith.maximumf %9, %10 : vector<8x64xf32>
    %c0_6 = arith.constant 0 : index
    %c0_7 = arith.constant 0 : index
    %12 = vector.load %arg3[%c0_6, %c0_7] : memref<1x64xf32, #tpu.memory_space<vmem>>, vector<1x64xf32>
    %c0_8 = arith.constant 0 : index
    %c0_9 = arith.constant 0 : index
    %13 = vector.load %arg4[%c0_8, %c0_9] : memref<1x64xf32, #tpu.memory_space<vmem>>, vector<1x64xf32>
    %cst_10 = arith.constant 0.000000e+00 : f32
    %14 = vector.shape_cast %2 : vector<8x1xi1> to vector<8x1xi1>
    %15 = vector.broadcast %14 : vector<8x1xi1> to vector<8x64xi1>
    %16 = vector.broadcast %cst_10 : f32 to vector<8x64xf32>
    %17 = arith.select %15, %11, %16 : vector<8x64xi1>, vector<8x64xf32>
    %cst_11 = arith.constant dense<0.000000e+00> : vector<64xf32>
    %18 = vector.multi_reduction <add>, %17, %cst_11 [0] : vector<8x64xf32> to vector<64xf32>
    %19 = vector.shape_cast %18 : vector<64xf32> to vector<1x64xf32>
    %cst_12 = arith.constant 1.250000e-01 : f32
    %20 = vector.broadcast %cst_12 : f32 to vector<1x64xf32>
    %21 = arith.mulf %19, %20 : vector<1x64xf32>
    %22 = arith.mulf %17, %17 : vector<8x64xf32>
    %cst_13 = arith.constant dense<0.000000e+00> : vector<64xf32>
    %23 = vector.multi_reduction <add>, %22, %cst_13 [0] : vector<8x64xf32> to vector<64xf32>
    %24 = vector.shape_cast %23 : vector<64xf32> to vector<1x64xf32>
    %cst_14 = arith.constant 1.250000e-01 : f32
    %25 = vector.broadcast %cst_14 : f32 to vector<1x64xf32>
    %26 = arith.mulf %24, %25 : vector<1x64xf32>
    %27 = arith.mulf %21, %21 : vector<1x64xf32>
    %28 = arith.subf %26, %27 : vector<1x64xf32>
    %29 = vector.broadcast %21 : vector<1x64xf32> to vector<8x64xf32>
    %30 = arith.subf %11, %29 : vector<8x64xf32>
    %cst_15 = arith.constant 9.99999974E-6 : f32
    %31 = vector.broadcast %cst_15 : f32 to vector<1x64xf32>
    %32 = arith.addf %28, %31 : vector<1x64xf32>
    %33 = math.rsqrt %32 : vector<1x64xf32>
    %34 = arith.mulf %33, %12 : vector<1x64xf32>
    %35 = vector.broadcast %34 : vector<1x64xf32> to vector<8x64xf32>
    %36 = arith.mulf %30, %35 : vector<8x64xf32>
    %37 = vector.broadcast %13 : vector<1x64xf32> to vector<8x64xf32>
    %38 = arith.addf %36, %37 : vector<8x64xf32>
    %c0_16 = arith.constant 0 : index
    %c0_17 = arith.constant 0 : index
    %39 = vector.load %arg5[%c0_16, %c0_17] : memref<64x64xbf16, #tpu.memory_space<vmem>>, vector<64x64xbf16>
    %c0_18 = arith.constant 0 : index
    %c0_19 = arith.constant 0 : index
    %40 = vector.load %arg6[%c0_18, %c0_19] : memref<1x64xf32, #tpu.memory_space<vmem>>, vector<1x64xf32>
    %41 = arith.truncf %38 : vector<8x64xf32> to vector<8x64xbf16>
    %cst_20 = arith.constant dense<0.000000e+00> : vector<8x64xf32>
    %42 = tpu.matmul %41, %39, %cst_20 {dimension_numbers = #tpu.dot_dimension_numbers<[1], [0], [0], [1], [0, 0, 1, 1], [], []>} : vector<8x64xbf16>, vector<64x64xbf16>, vector<8x64xf32> -> vector<8x64xf32>
    %43 = vector.broadcast %40 : vector<1x64xf32> to vector<8x64xf32>
    %44 = arith.addf %42, %43 : vector<8x64xf32>
    %cst_21 = arith.constant 0.000000e+00 : f32
    %45 = vector.broadcast %cst_21 : f32 to vector<8x64xf32>
    %46 = arith.maximumf %44, %45 : vector<8x64xf32>
    %c0_22 = arith.constant 0 : index
    %c0_23 = arith.constant 0 : index
    %47 = vector.load %arg7[%c0_22, %c0_23] : memref<1x64xf32, #tpu.memory_space<vmem>>, vector<1x64xf32>
    %c0_24 = arith.constant 0 : index
    %c0_25 = arith.constant 0 : index
    %48 = vector.load %arg8[%c0_24, %c0_25] : memref<1x64xf32, #tpu.memory_space<vmem>>, vector<1x64xf32>
    %cst_26 = arith.constant 0.000000e+00 : f32
    %49 = vector.shape_cast %2 : vector<8x1xi1> to vector<8x1xi1>
    %50 = vector.broadcast %49 : vector<8x1xi1> to vector<8x64xi1>
    %51 = vector.broadcast %cst_26 : f32 to vector<8x64xf32>
    %52 = arith.select %50, %46, %51 : vector<8x64xi1>, vector<8x64xf32>
    %cst_27 = arith.constant dense<0.000000e+00> : vector<64xf32>
    %53 = vector.multi_reduction <add>, %52, %cst_27 [0] : vector<8x64xf32> to vector<64xf32>
    %54 = vector.shape_cast %53 : vector<64xf32> to vector<1x64xf32>
    %cst_28 = arith.constant 1.250000e-01 : f32
    %55 = vector.broadcast %cst_28 : f32 to vector<1x64xf32>
    %56 = arith.mulf %54, %55 : vector<1x64xf32>
    %57 = arith.mulf %52, %52 : vector<8x64xf32>
    %cst_29 = arith.constant dense<0.000000e+00> : vector<64xf32>
    %58 = vector.multi_reduction <add>, %57, %cst_29 [0] : vector<8x64xf32> to vector<64xf32>
    %59 = vector.shape_cast %58 : vector<64xf32> to vector<1x64xf32>
    %cst_30 = arith.constant 1.250000e-01 : f32
    %60 = vector.broadcast %cst_30 : f32 to vector<1x64xf32>
    %61 = arith.mulf %59, %60 : vector<1x64xf32>
    %62 = arith.mulf %56, %56 : vector<1x64xf32>
    %63 = arith.subf %61, %62 : vector<1x64xf32>
    %64 = vector.broadcast %56 : vector<1x64xf32> to vector<8x64xf32>
    %65 = arith.subf %46, %64 : vector<8x64xf32>
    %cst_31 = arith.constant 9.99999974E-6 : f32
    %66 = vector.broadcast %cst_31 : f32 to vector<1x64xf32>
    %67 = arith.addf %63, %66 : vector<1x64xf32>
    %68 = math.rsqrt %67 : vector<1x64xf32>
    %69 = arith.mulf %68, %47 : vector<1x64xf32>
    %70 = vector.broadcast %69 : vector<1x64xf32> to vector<8x64xf32>
    %71 = arith.mulf %65, %70 : vector<8x64xf32>
    %72 = vector.broadcast %48 : vector<1x64xf32> to vector<8x64xf32>
    %73 = arith.addf %71, %72 : vector<8x64xf32>
    %c0_32 = arith.constant 0 : index
    %c0_33 = arith.constant 0 : index
    %74 = vector.load %arg9[%c0_32, %c0_33] : memref<64x4xbf16, #tpu.memory_space<vmem>>, vector<64x4xbf16>
    %c0_34 = arith.constant 0 : index
    %c0_35 = arith.constant 0 : index
    %75 = vector.load %arg10[%c0_34, %c0_35] : memref<1x4xf32, #tpu.memory_space<vmem>>, vector<1x4xf32>
    %76 = arith.truncf %73 : vector<8x64xf32> to vector<8x64xbf16>
    %cst_36 = arith.constant dense<0.000000e+00> : vector<8x4xf32>
    %77 = tpu.matmul %76, %74, %cst_36 {dimension_numbers = #tpu.dot_dimension_numbers<[1], [0], [0], [1], [0, 0, 1, 1], [], []>} : vector<8x64xbf16>, vector<64x4xbf16>, vector<8x4xf32> -> vector<8x4xf32>
    %78 = vector.broadcast %75 : vector<1x4xf32> to vector<8x4xf32>
    %79 = arith.addf %77, %78 : vector<8x4xf32>
    %c0_37 = arith.constant 0 : index
    %c0_38 = arith.constant 0 : index
    %80 = vector.load %arg11[%c0_37, %c0_38] : memref<8x4xf32, #tpu.memory_space<vmem>>, vector<8x4xf32>
    tpu.vector_store %arg11[%c0_37, %c0_38], %79 {strides = array<i32>} : memref<8x4xf32, #tpu.memory_space<vmem>>, vector<8x4xf32>,
    return
  }
}

</mosaic_0001>

<bundles_post_ra>
// kernel: tpu_custom_call.1
= control target key start
LH: loop header
LB: loop body
LE: loop exit
PB: predicated region body
PF: predicated region fallthrough
CT: control target
= control target key end

     0   :  { %16 = vsyncpa [#allocation3], 0  ;;  %s724_s0 = inlined_call_operand.vmem [shape: f32[8,24], index: 0, kind: input, shape index: {}]   ;;  %s725_s1 = inlined_call_operand.vmem [shape: bf16[24,64], index: 1, kind: input, shape index: {}]   ;;  %s726_s2 = inlined_call_operand.hbm [shape: f32[1,64], index: 2, kind: input, shape index: {}]   ;;  %s727_s3 = inlined_call_operand.hbm [shape: f32[1,64], index: 3, kind: input, shape index: {}]   ;;  %s728_s4 = inlined_call_operand.hbm [shape: f32[1,64], index: 4, kind: input, shape index: {}]   ;;  %s729_s5 = inlined_call_operand.vmem [shape: bf16[64,64], index: 5, kind: input, shape index: {}]   ;;  %s730_s6 = inlined_call_operand.vmem [shape: f32[1,64], index: 6, kind: input, shape index: {}]   ;;  %s731_s7 = inlined_call_operand.vmem [shape: f32[1,64], index: 7, kind: input, shape index: {}]   ;;  %s732_s8 = inlined_call_operand.vmem [shape: f32[1,64], index: 8, kind: input, shape index: {}]   ;;  %s733_s9 = inlined_call_operand.vmem [shape: bf16[64,4], index: 9, kind: input, shape index: {}]   ;;  %s734_s10 = inlined_call_operand.vmem [shape: f32[1,4], index: 10, kind: input, shape index: {}]   ;;  %s735_s11 = inlined_call_operand.vmem [shape: f32[8,4], index: 11, kind: output, shape index: {}]  }
   0x1   :  { %17 = vsyncpa [#allocation5], 0  ;;  %s553_s17 = smov [#allocation4]   ;;  %s554_s19 = smov [#allocation2]  }
   0x2   :  { %s38_s18 = sshll.u32 %s553_s17, 4  ;;  %s28_s20 = sshll.u32 %s554_s19, 4  ;;  %s39_s18 = int_to_ptr.vmem [resolvable:$true] %s38_s18  ;;  %s29_s20 = int_to_ptr.vmem [resolvable:$true] %s28_s20 }
   0x3   :  { %s483_s23 = scalar_lea.hbm %s727_s3, 16 }
   0x4   :  { %p484_p0 = scmp.ne.s32.totalorder %s727_s3, %s483_s23  ;;  %p487_p1 = scmp.lt.u32.totalorder %s483_s23, %s727_s3 }
   0x6   :  { %p489_p2 = pnand %p487_p1, %p484_p0 }
   0x8   :  { %492 = shalt.err (!%p489_p2)
}
   0x9   :  { %s493_s28 = scalar_lea.vmem %s39_s18, 16  ;;  %s497_s29 = scalar_lea.vmem %s39_s18, 32 }
   0xa   :  { %p494_p3 = scmp.ne.s32.totalorder %s39_s18, %s493_s28  ;;  %p498_p4 = scmp.lt.s32.totalorder %s39_s18, %s39_s18 }
   0xb   :  { %p499_p5 = scmp.lt.s32.totalorder %s497_s29, %s493_s28 }
   0xd   :  { %p500_p6 = por %p499_p5, %p498_p4 }
   0xf   :  { %p501_p7 = pnand %p500_p6, %p494_p3 }
  0x11   :  { %504 = shalt.err (!%p501_p7)
}
  0x12   :  { %41 = dma.hbm_to_vmem [thread:$0]  %s727_s3, 16, %s39_s18, [#allocation5]  }
  0x13   :  { %s505_s15 = scalar_lea.hbm %s726_s2, 16 }
  0x14   :  { %p506_p8 = scmp.ne.s32.totalorder %s726_s2, %s505_s15  ;;  %p509_p9 = scmp.lt.u32.totalorder %s505_s15, %s726_s2 }
  0x16   :  { %p511_p10 = pnand %p509_p9, %p506_p8 }
  0x18   :  { %514 = shalt.err (!%p511_p10)
}
  0x19   :  { %s515_s22 = scalar_lea.vmem %s29_s20, 16  ;;  %s519_s23 = scalar_lea.vmem %s29_s20, 32 }
  0x1a   :  { %p516_p11 = scmp.ne.s32.totalorder %s29_s20, %s515_s22  ;;  %p520_p12 = scmp.lt.s32.totalorder %s29_s20, %s29_s20 }
  0x1b   :  { %p521_p13 = scmp.lt.s32.totalorder %s519_s23, %s515_s22 }
  0x1d   :  { %p522_p0 = por %p521_p13, %p520_p12 }
  0x1f   :  { %p523_p1 = pnand %p522_p0, %p516_p11 }
  0x21   :  { %526 = shalt.err (!%p523_p1)
}
  0x22   :  { %31 = dma.hbm_to_vmem [thread:$0]  %s726_s2, 16, %s29_s20, [#allocation3]  }
  0x23   :  { %s555_s24 = smov [#allocation6]   ;;  %s527_s28 = scalar_lea.hbm %s728_s4, 16 }
  0x24   :  { %s48_s25 = sshll.u32 %s555_s24, 4  ;;  %p528_p2 = scmp.ne.s32.totalorder %s728_s4, %s527_s28  ;;  %s49_s25 = int_to_ptr.vmem [resolvable:$true] %s48_s25 }
  0x25   :  { %p531_p3 = scmp.lt.u32.totalorder %s527_s28, %s728_s4 }
  0x27   :  { %p533_p4 = pnand %p531_p3, %p528_p2 }
  0x29   :  { %536 = shalt.err (!%p533_p4)
}
  0x2a   :  { %s537_s14 = scalar_lea.vmem %s49_s25, 16  ;;  %s541_s2 = scalar_lea.vmem %s49_s25, 32 }
  0x2b   :  { %p538_p5 = scmp.ne.s32.totalorder %s49_s25, %s537_s14  ;;  %p542_p6 = scmp.lt.s32.totalorder %s49_s25, %s49_s25 }
  0x2c   :  { %p543_p7 = scmp.lt.s32.totalorder %s541_s2, %s537_s14 }
  0x2e   :  { %p544_p8 = por %p543_p7, %p542_p6 }
  0x30   :  { %p545_p9 = pnand %p544_p8, %p538_p5 }
  0x32   :  { %548 = shalt.err (!%p545_p9)
}
  0x33   :  { %51 = dma.hbm_to_vmem [thread:$0]  %s728_s4, 16, %s49_s25, [#allocation5]  }
  0x34   :  { %549 = dma.done.wait [#allocation3], 16  }
  0x35   :  { %550 = vsyncadd [#allocation3], 4294967280 }
  0x36   :  { %551 = dma.done.wait [#allocation5], 32  }
  0x37   :  { %552 = vsyncadd [#allocation5], 4294967264  ;;  %v556_v0 = vmov 0.0   ;;  %vm557_vm0 = vmmov 0   ;;  %v469_v1 = vld [vmem:[%s725_s1] sm:$0xff]   ;;  %vm102_vm1 = vcmask 1043456   ;;  %v176_v37 = vlaneseq }
  0x38   :  { %432 = vmatprep.subr.bf16.mxu0 %v556_v0  ;;  %436 = vmatprep.mubr.msk.bf16.mxu0 %vm557_vm0, %v556_v0  ;;  %v470_v2 = vld [vmem:[%s725_s1 + $0x8] ss:$0 sps:$4 sm:$0xff]   ;;  %v77_v3 = vld [vmem:[%s724_s0] sm:$0xff]  ;;  %vm98_vm2 = vcmask 195584   ;;  %v473_v8 = vld [vmem:[%s729_s5 + $0x10] sm:$0xff]   ;;  %vm152_vm3 = vcmask 523264  }
  0x39   :  { %440 = vmatprep.subr.bf16.mxu1 %v556_v0  ;;  %448 = vmatprep.mubr.msk.bf16.mxu1 %vm557_vm0, %v556_v0  ;;  %v104_v4 = vsel %vm102_vm1, %v470_v2, 0  ;;  %v82_v5 = vpack.c.bf16 %v77_v3, %v77_v3  ;;  %v471_v6 = vld [vmem:[%s729_s5] sm:$0xff]   ;;  %v472_v7 = vld [vmem:[%s729_s5 + $0x8] sm:$0xff]   ;;  %v474_v9 = vld [vmem:[%s729_s5 + $0x18] sm:$0xff]   ;;  %v177_v38 = vshrl.u32 %v176_v37, 7  ;;  %vm393_vm4 = vcmask 31744  }
  0x3a   :  { %433 = vmatpush3.bf16.msra.mxu0 %v469_v1  ;;  %441 = vmatpush3.bf16.msra.mxu1 %v471_v6  ;;  %v401_v10 = vld [vmem:[#allocation2] ss:$0 sm:$0xff]  ;;  %v147_v39 = vld [vmem:[#allocation4] sm:$0x1]  ;;  %v405_v45 = vld [vmem:[#allocation6] ss:$0 sm:$0xff] }
  0x3b   :  { %434 = vmatprep.subr.bf16.mxu0 %v556_v0  ;;  %442 = vmatprep.subr.bf16.mxu1 %v556_v0  ;;  %v178_v40 = vsub.s32 0, %v177_v38  ;;  %v475_v49 = vld [vmem:[%s733_s9] sm:$0xff]   ;;  %v476_v50 = vld [vmem:[%s733_s9 + $0x8] sm:$0xff]   ;;  %v477_v51 = vld [vmem:[%s733_s9 + $0x10] sm:$0xff]  }
  0x3c   :  { %v478_v52 = vld [vmem:[%s733_s9 + $0x18] sm:$0xff]   ;;  %v406_v53 = vld [vmem:[%s730_s6] ss:$0 sm:$0xff] }
  0x3e   :  { %435 = vmatpush3.bf16.msra.mxu0 %v104_v4  ;;  %443 = vmatpush3.bf16.msra.mxu1 %v472_v7 }
  0x3f   :  { %452 = vmatprep.subr.bf16.mxu0 %v556_v0  ;;  %444 = vmatprep.subr.bf16.mxu1 %v556_v0 }
  0x41   :  { %437 = vmatmul.mubr.msk.bf16.vlgmr.msra.gmra.mrb[0].mxu0 %vm98_vm2, %v82_v5 }
  0x42   :  { %460 = vmatprep.mubr.msk.bf16.mxu0 %vm557_vm0, %v556_v0  ;;  %445 = vmatpush3.bf16.msra.mxu1 %v473_v8 }
  0x43   :  { %446 = vmatprep.subr.bf16.mxu1 %v556_v0  ;;  %453 = vmatpush3.bf16.msra.mxu0 %v475_v49 }
  0x44   :  { %454 = vmatprep.subr.bf16.mxu0 %v556_v0 }
  0x46   :  { %447 = vmatpush3.bf16.msra.mxu1 %v474_v9 }
  0x47   :  { %455 = vmatpush3.bf16.msra.mxu0 %v476_v50 }
  0x48   :  { %456 = vmatprep.subr.bf16.mxu0 %v556_v0 }
  0x4b   :  { %457 = vmatpush3.bf16.msra.mxu0 %v477_v51 }
  0x4c   :  { %458 = vmatprep.subr.bf16.mxu0 %v556_v0 }
  0x4f   :  { %459 = vmatpush3.bf16.msra.mxu0 %v478_v52 }
 0x114   :  { %v140_v11 = vpop.f32.mrb[0].mxu0 }
 0x115   :  { %v141_v12 = vadd.f32 %v401_v10, %v140_v11  ;;  %v438_v13 = vpop.f32.mrb[1].mxu0 }
 0x116   :  { %v143_v14 = vpop.f32.mrb[2].mxu0 }
 0x117   :  { %v146_v15 = vmax.f32 %v141_v12, 0.0  ;;  %v439_v16 = vpop.f32.mrb[3].mxu0 }
 0x118   :  { %v272_v16 = vld [vmem:[%s731_s7] sm:$0x1] }
 0x119   :  { %v153_v17 = vsel %vm152_vm3, %v146_v15, 0.0  ;;  %v161_v18 = vmul.f32 %v146_v15, %v146_v15 }
 0x11a   :  { %v154_v19 = vrot.slane %v153_v17, 4 }
 0x11b   :  { %v162_v20 = vsel %vm152_vm3, %v161_v18, 0.0 }
 0x11c   :  { %v155_v21 = vadd.f32 %v154_v19, %v153_v17  ;;  %v163_v22 = vrot.slane %v162_v20, 4 }
 0x11e   :  { %v156_v23 = vrot.slane %v155_v21, 2  ;;  %v164_v24 = vadd.f32 %v163_v22, %v162_v20 }
 0x120   :  { %v157_v25 = vadd.f32 %v156_v23, %v155_v21  ;;  %v165_v26 = vrot.slane %v164_v24, 2  ;;  %v412_v21 = vld [vmem:[%s732_s8] ss:$0 sm:$0xff] }
 0x122   :  { %v158_v27 = vrot.slane %v157_v25, 1  ;;  %v166_v28 = vadd.f32 %v165_v26, %v164_v24 }
 0x124   :  { %v159_v29 = vadd.f32 %v158_v27, %v157_v25  ;;  %v167_v30 = vrot.slane %v166_v28, 1  ;;  %v413_v25 = vld [vmem:[%s734_s10] ss:$0 sm:$0xff] }
 0x126   :  { %v160_v31 = vmul.f32 0.125, %v159_v29  ;;  %v168_v32 = vadd.f32 %v167_v30, %v166_v28 }
 0x128   :  { %v169_v33 = vmul.f32 0.125, %v168_v32  ;;  %v170_v34 = vmul.f32 %v160_v31, %v160_v31  ;;  %v172_v43 = vsub.f32 %v146_v15, %v160_v31 }
 0x12a   :  { %v171_v35 = vsub.f32 %v169_v33, %v170_v34 }
 0x12c   :  { %v173_v36 = vadd.f32 1e-05, %v171_v35 }
 0x12e   :  { %479 = vrsqrt.f32 %v173_v36 }
 0x138   :  { %v480_v41 = vpop.eup %479 }
 0x139   :  { %v175_v42 = vmul.f32 %v480_v41, %v147_v39 }
 0x13b   :  { %v179_v44 = vrot.slane %v175_v42, %v178_v40 }
 0x13d   :  { %v180_v46 = vmul.f32 %v179_v44, %v172_v43 }
 0x13f   :  { %v187_v47 = vadd.f32 %v405_v45, %v180_v46 }
 0x141   :  { %v197_v48 = vpack.c.bf16 %v187_v47, %v187_v47 }
 0x143   :  { %449 = vmatmul.mubr.msk.bf16.vlgmr.msra.gmra.mrb[0].mxu1 %vm152_vm3, %v197_v48 }
 0x216   :  { %v265_v54 = vpop.f32.mrb[0].mxu1 }
 0x217   :  { %v266_v55 = vadd.f32 %v406_v53, %v265_v54  ;;  %v450_v56 = vpop.f32.mrb[1].mxu1 }
 0x218   :  { %v268_v57 = vpop.f32.mrb[2].mxu1 }
 0x219   :  { %v271_v58 = vmax.f32 %v266_v55, 0.0  ;;  %v451_v59 = vpop.f32.mrb[3].mxu1 }
 0x21b   :  { %v275_v60 = vsel %vm152_vm3, %v271_v58, 0.0  ;;  %v283_v61 = vmul.f32 %v271_v58, %v271_v58 }
 0x21c   :  { %v276_v62 = vrot.slane %v275_v60, 4 }
 0x21d   :  { %v284_v63 = vsel %vm152_vm3, %v283_v61, 0.0 }
 0x21e   :  { %v277_v0 = vadd.f32 %v276_v62, %v275_v60  ;;  %v285_v1 = vrot.slane %v284_v63, 4 }
 0x220   :  { %v278_v2 = vrot.slane %v277_v0, 2  ;;  %v286_v3 = vadd.f32 %v285_v1, %v284_v63 }
 0x222   :  { %v279_v4 = vadd.f32 %v278_v2, %v277_v0  ;;  %v287_v5 = vrot.slane %v286_v3, 2 }
 0x224   :  { %v280_v6 = vrot.slane %v279_v4, 1  ;;  %v288_v7 = vadd.f32 %v287_v5, %v286_v3 }
 0x226   :  { %v281_v8 = vadd.f32 %v280_v6, %v279_v4  ;;  %v289_v9 = vrot.slane %v288_v7, 1 }
 0x228   :  { %v282_v10 = vmul.f32 0.125, %v281_v8  ;;  %v290_v11 = vadd.f32 %v289_v9, %v288_v7 }
 0x22a   :  { %v291_v12 = vmul.f32 0.125, %v290_v11  ;;  %v292_v13 = vmul.f32 %v282_v10, %v282_v10  ;;  %v294_v19 = vsub.f32 %v271_v58, %v282_v10 }
 0x22c   :  { %v293_v14 = vsub.f32 %v291_v12, %v292_v13 }
 0x22e   :  { %v295_v15 = vadd.f32 1e-05, %v293_v14 }
 0x230   :  { %481 = vrsqrt.f32 %v295_v15 }
 0x23a   :  { %v482_v17 = vpop.eup %481 }
 0x23b   :  { %v297_v18 = vmul.f32 %v482_v17, %v272_v16 }
 0x23d   :  { %v301_v20 = vrot.slane %v297_v18, %v178_v40 }
 0x23f   :  { %v302_v22 = vmul.f32 %v301_v20, %v294_v19 }
 0x241   :  { %v309_v23 = vadd.f32 %v412_v21, %v302_v22 }
 0x243   :  { %v319_v24 = vpack.c.bf16 %v309_v23, %v309_v23 }
 0x245   :  { %461 = vmatmul.mubr.msk.bf16.vlgmr.msra.gmra.mrb[4].mxu0 %vm152_vm3, %v319_v24 }
 0x318   :  { %v387_v26 = vpop.f32.mrb[4].mxu0 }
 0x319   :  { %v388_v27 = vadd.f32 %v413_v25, %v387_v26  ;;  %v462_v28 = vpop.f32.mrb[5].mxu0 }
 0x31a   :  { %v390_v29 = vpop.f32.mrb[6].mxu0 }
 0x31b   :  { %394 = vst.msk [vmem:[%s735_s11] sm:$0xff] %vm393_vm4, %v388_v27  ;;  %v463_v30 = vpop.f32.mrb[7].mxu0 }
 0x31c   :  { %399 = vsyncpa [#allocation3], 1 }
 0x31d   :  { %400 = vsyncpa [#allocation5], 1 }

</bundles_post_ra>
